<compile_context>
chip_gen: v7x
topology: tpu7x:2x2x1
jax: 0.10.0
libtpu: 0.0.40
codegen_flags: <defaults>
</compile_context>

<pallas_src>
import math
import functools

import jax
import jax.numpy as jnp
from jax.experimental import pallas as pl
from jax.experimental.pallas import tpu as pltpu


def _round_up(x, m):
    return (x + m - 1) // m * m


def _choose_tn(n_pad, k_pad, m_itemsize=2, max_tile_bytes=2 << 20):
    """Largest multiple-of-128 output tile that divides n_pad, fits the
    per-buffer VMEM budget, and (when possible) leaves >= 2 grid tiles so the
    two TensorCores of a v7x chip can both be used."""
    cap = max(128, (max_tile_bytes // (k_pad * m_itemsize)) // 128 * 128)
    cap = min(n_pad, cap)
    candidates = [t for t in range(128, cap + 1, 128) if n_pad % t == 0]
    if not candidates:
        return 128
    multi_tile = [t for t in candidates if n_pad // t >= 2]
    return max(multi_tile) if multi_tile else max(candidates)


# ----------------------------------------------------------------------------
# Precompute (equivalent of Cyl2BEV.__init__): single-row interpolation matrix.
# ----------------------------------------------------------------------------
def build_cyl2bev(cyl_size, bev_size, sensor_h=1.73,
                  fov_phi=(-math.pi, math.pi),
                  range_xy=(-50.0, 50.0, -50.0, 50.0),
                  z_range=None, weight_dtype=jnp.bfloat16):
    """Returns (M_f32, M_padded, sensor_row).

    M_f32    : (W_c, H_b*W_b) float32 — grid_sample(bilinear, zeros padding,
               align_corners=True) restricted to the constant sensor row;
               <= 2 nonzeros per column (wx0, wx1).
    M_padded : MXU-ready operand, padded to (round_up(W_c,128),
               round_up(N,128)) and cast to `weight_dtype` ONCE here.
    """
    H_c, W_c = cyl_size
    H_b, W_b = bev_size
    assert H_c > 1 and W_c > 1 and H_b > 1 and W_b > 1, "all sizes must be > 1"
    xmin, xmax, ymin, ymax = range_xy
    if z_range is None:
        z_range = (-sensor_h, sensor_h)
    z_min, z_max = z_range
    sensor_row = int(round((0.0 - z_min) / (z_max - z_min) * (H_c - 1)))
    sensor_row = max(0, min(H_c - 1, sensor_row))

    ii, jj = jnp.meshgrid(jnp.arange(H_b, dtype=jnp.float32),
                          jnp.arange(W_b, dtype=jnp.float32), indexing="ij")
    x = xmin + jj / (W_b - 1) * (xmax - xmin)
    y = ymax - ii / (H_b - 1) * (ymax - ymin)
    phi = jnp.arctan2(y, x)
    col = (phi - fov_phi[0]) / (fov_phi[1] - fov_phi[0]) * (W_c - 1)
    # normalize -> grid_sample(align_corners=True) un-normalize round trip.
    grid_x = 2.0 * col / (W_c - 1) - 1.0
    ix = (grid_x + 1.0) * 0.5 * (W_c - 1)
    # The sampling row is analytically the integer sensor_row (wy0 == 1), so
    # only that single cylinder row contributes (no second band row).
    x0 = jnp.floor(ix)
    x1 = x0 + 1.0
    wx1 = ix - x0
    wx0 = 1.0 - wx1

    N = H_b * W_b
    K = W_c
    p = jnp.arange(N, dtype=jnp.int32)
    M = jnp.zeros((K, N), dtype=jnp.float32)
    for xc, w in ((x0, wx0), (x1, wx1)):
        valid = (xc >= 0) & (xc <= W_c - 1)          # padding_mode='zeros'
        xi = jnp.clip(xc, 0, W_c - 1).astype(jnp.int32).reshape(-1)
        wv = jnp.where(valid, w, 0.0).astype(jnp.float32).reshape(-1)
        M = M.at[xi, p].add(wv)

    K_pad = _round_up(K, 128)
    N_pad = _round_up(N, 128)
    M_padded = jnp.pad(M, ((0, K_pad - K), (0, N_pad - N))).astype(weight_dtype)
    return M, M_padded, sensor_row


# ----------------------------------------------------------------------------
# Pallas kernel: one (R_pad, K_pad) @ (K_pad, TN) MXU matmul per N tile.
# ----------------------------------------------------------------------------
def cyl2bev_kernel(a_ref, m_ref, o_ref):
    # a_ref: (R_pad, K_pad) bf16   m_ref: (K_pad, TN) bf16   o_ref: (R_pad, TN)
    o_ref[...] = jnp.dot(a_ref[...], m_ref[...],
                         preferred_element_type=jnp.float32).astype(o_ref.dtype)


@functools.partial(jax.jit, static_argnames=("bev_size", "sensor_row"))
def cyl2bev_forward(cyl_feat, m_padded, *, bev_size, sensor_row):
    B, C, H_c, W_c = cyl_feat.shape
    H_b, W_b = bev_size
    N = H_b * W_b
    K_pad, N_pad = m_padded.shape
    assert K_pad >= W_c and N_pad >= N

    # Fold batch+channels into the matmul rows; read only the sensor row.
    R = B * C
    R_pad = _round_up(R, 16)                      # bf16 sublane packing (16,128)
    a = cyl_feat[:, :, sensor_row, :].reshape(R, W_c)
    a = jnp.pad(a, ((0, R_pad - R), (0, K_pad - W_c))).astype(jnp.bfloat16)

    m_itemsize = jnp.dtype(m_padded.dtype).itemsize
    out_itemsize = jnp.dtype(cyl_feat.dtype).itemsize
    tn = _choose_tn(N_pad, K_pad, m_itemsize)
    grid = (N_pad // tn,)

    # VMEM budget: A (constant block) + double-buffered M tile + out tile.
    needed = (2 * a.size * a.dtype.itemsize
              + 2 * K_pad * tn * m_itemsize
              + 2 * R_pad * tn * out_itemsize)
    vmem_limit = int(min(max(4 * needed, 8 << 20), 32 << 20))

    cost = pl.CostEstimate(
        flops=2 * R_pad * K_pad * N_pad,
        transcendentals=0,
        bytes_accessed=(a.size * a.dtype.itemsize
                        + m_padded.size * m_itemsize
                        + R_pad * N_pad * out_itemsize),
    )

    out_flat = pl.pallas_call(
        cyl2bev_kernel,
        out_shape=jax.ShapeDtypeStruct((R_pad, N_pad), cyl_feat.dtype),
        grid_spec=pltpu.PrefetchScalarGridSpec(
            num_scalar_prefetch=0,
            grid=grid,                                    # tile output columns
            in_specs=[
                pl.BlockSpec((R_pad, K_pad), lambda n: (0, 0)),  # whole A (revisited)
                pl.BlockSpec((K_pad, tn), lambda n: (0, n)),     # M column tile
            ],
            out_specs=pl.BlockSpec((R_pad, tn), lambda n: (0, n)),
        ),
        compiler_params=pltpu.CompilerParams(
            dimension_semantics=("parallel",),
            vmem_limit_bytes=vmem_limit),
        cost_estimate=cost,
    )(a, m_padded)

    out = out_flat[:R]
    if N_pad != N:
        out = out[:, :N]
    return out.reshape(B, C, H_b, W_b)


if __name__ == "__main__":
    # Small shapes consistent with the module:
    #   cylinder feature map: B=2, C=4, H_c=16 (z bins), W_c=64 (azimuth)
    #   BEV output          : H_b=32, W_b=32
    B, C = 2, 4
    cyl_size = (16, 64)
    bev_size = (32, 32)
    H_b, W_b = bev_size
    W_c = cyl_size[1]
    N = H_b * W_b

    key = jax.random.PRNGKey(0)
    cyl_feat = jax.random.normal(key, (B, C, *cyl_size), dtype=jnp.float32)

    M_f32, M_padded, sensor_row = build_cyl2bev(cyl_size, bev_size)

    out = cyl2bev_forward(cyl_feat, M_padded, bev_size=bev_size,
                          sensor_row=sensor_row)
    out = jax.block_until_ready(out)
    assert out.shape == (B, C, *bev_size)

    # Reference 1 (tight): identical bf16-quantized operands, f32 accumulate —
    # validates the Pallas matmul itself.
    A = cyl_feat[:, :, sensor_row, :].reshape(B * C, W_c)
    A_q = A.astype(jnp.bfloat16).astype(jnp.float32)
    M_q = M_padded[:W_c, :N].astype(jnp.float32)
    ref_mm = jnp.dot(A_q, M_q,
                     preferred_element_type=jnp.float32).reshape(out.shape)
    assert jnp.allclose(out, ref_mm, atol=2e-3, rtol=2e-3)

    # Reference 2 (semantic): independent gather-form grid_sample equivalent
    # in full f32; tolerance covers the bf16 operand quantization.
    def reference_grid_sample(feat):
        xmin, xmax, ymin, ymax = (-50.0, 50.0, -50.0, 50.0)
        ii, jj = jnp.meshgrid(jnp.arange(H_b, dtype=jnp.float32),
                              jnp.arange(W_b, dtype=jnp.float32), indexing="ij")
        x = xmin + jj / (W_b - 1) * (xmax - xmin)
        y = ymax - ii / (H_b - 1) * (ymax - ymin)
        phi = jnp.arctan2(y, x)
        col = (phi + math.pi) / (2.0 * math.pi) * (W_c - 1)
        x0 = jnp.floor(col)
        x1 = x0 + 1.0
        wx1 = (col - x0).reshape(-1)
        wx0 = 1.0 - wx1
        row = feat[:, :, sensor_row, :]                       # (B, C, W_c)

        def tap(xc, w):
            valid = ((xc >= 0) & (xc <= W_c - 1)).reshape(-1)
            xi = jnp.clip(xc, 0, W_c - 1).astype(jnp.int32).reshape(-1)
            return row[:, :, xi] * jnp.where(valid, w, 0.0)

        o = tap(x0, wx0) + tap(x1, wx1)
        return o.reshape(B, C, H_b, W_b)

    ref_f32 = reference_grid_sample(cyl_feat)
    assert jnp.allclose(out, ref_f32, atol=5e-2, rtol=5e-2)

    print("KERNEL_OK")
</pallas_src>

<mosaic_0001>
module attributes {stable_mosaic.version = 11 : i64} {
  func.func @cyl2bev_kernel(%arg0: i32, %arg1: memref<16x128xbf16, #tpu.memory_space<vmem>>, %arg2: memref<128x512xbf16, #tpu.memory_space<vmem>>, %arg3: memref<16x512xf32, #tpu.memory_space<vmem>>) attributes {dimension_semantics = [#tpu.dimension_semantics<parallel>], iteration_bounds = array<i64: 2>, scalar_prefetch = 0 : i64, scratch_operands = 0 : i64, tpu.core_type = #tpu.core_type<tc>, window_params = [{pipeline_mode = #tpu.pipeline_mode<synchronous>, transform_indices = @transform_0, window_bounds = array<i64: 16, 128>}, {transform_indices = @transform_1, window_bounds = array<i64: 128, 512>}, {transform_indices = @transform_2, window_bounds = array<i64: 16, 512>}]} {
    %c0 = arith.constant 0 : index
    %c0_0 = arith.constant 0 : index
    %0 = vector.load %arg1[%c0, %c0_0] : memref<16x128xbf16, #tpu.memory_space<vmem>>, vector<16x128xbf16>
    %c0_1 = arith.constant 0 : index
    %c0_2 = arith.constant 0 : index
    %1 = vector.load %arg2[%c0_1, %c0_2] : memref<128x512xbf16, #tpu.memory_space<vmem>>, vector<128x512xbf16>
    %cst = arith.constant dense<0.000000e+00> : vector<16x512xf32>
    %2 = tpu.matmul %0, %1, %cst {dimension_numbers = #tpu.dot_dimension_numbers<[1], [0], [0], [1], [0, 0, 1, 1], [], []>} : vector<16x128xbf16>, vector<128x512xbf16>, vector<16x512xf32> -> vector<16x512xf32>
    %c0_3 = arith.constant 0 : index
    %c0_4 = arith.constant 0 : index
    %3 = vector.load %arg3[%c0_3, %c0_4] : memref<16x512xf32, #tpu.memory_space<vmem>>, vector<16x512xf32>
    tpu.vector_store %arg3[%c0_3, %c0_4], %2 {strides = array<i32>} : memref<16x512xf32, #tpu.memory_space<vmem>>, vector<16x512xf32>,
    return
  }
  func.func @transform_0(%arg0: i32) -> (i32, i32) {
    %c0_i32 = arith.constant 0 : i32
    %c0_i32_0 = arith.constant 0 : i32
    %c0_i32_1 = arith.constant 0 : i32
    return %c0_i32, %c0_i32_0 : i32, i32
  }
  func.func @transform_1(%arg0: i32) -> (i32, i32) {
    %c0_i32 = arith.constant 0 : i32
    %c0_i32_0 = arith.constant 0 : i32
    return %c0_i32, %arg0 : i32, i32
  }
  func.func @transform_2(%arg0: i32) -> (i32, i32) {
    %c0_i32 = arith.constant 0 : i32
    %c0_i32_0 = arith.constant 0 : i32
    return %c0_i32, %arg0 : i32, i32
  }
}

</mosaic_0001>

<bundles_post_ra>
// kernel: cyl2bev_forward.1
= control target key start
LH: loop header
LB: loop body
LE: loop exit
PB: predicated region body
PF: predicated region fallthrough
CT: control target
= control target key end

     0   :  { %7 = vsyncpa [#allocation3], 0  ;;  %s963_s0 = inlined_call_operand.vmem [shape: bf16[16,128], index: 0, kind: input, shape index: {}]   ;;  %s964_s1 = inlined_call_operand.hbm [shape: bf16[128,1024], index: 1, kind: input, shape index: {}]   ;;  %s965_s2 = inlined_call_operand.vmem [shape: f32[16,1024], index: 2, kind: output, shape index: {}]  }
   0x1   :  { %9 = vsyncpa [#allocation3 + $0x1], 0  ;;  %s785_s9 = smov 0   ;;  %s787_s10 = smov 0  }
   0x2   :  { %s789_s11 = smov 0   ;;  %s791_s12 = smov 0  }
   0x3 LB: > { %s804_s13 = sadd.s32 4294967295, %s763_s12   ;;  %s807_s14 = sadd.s32 1, %s763_s12   ;;  %s763_s12 = sphi %s791_s12, %s974_s12   ;;  %s759_s11 = sphi %s789_s11, %s973_s11   ;;  %s755_s10 = sphi %s787_s10, %s972_s10   ;;  %s751_s9 = sphi %s785_s9, %s971_s9  }
   0x4   : > { %s40_s15 = ssub.s32 %s763_s12, %s807_s14  ;;  %s43_s16 = sadd.s32 1, %s759_s11 }
   0x5   : > { %p41_p0 = scmp.eq.s32.totalorder %s40_s15, 0  ;;  %p50_p1 = scmp.ne.s32.totalorder %s759_s11, %s755_s10 }
   0x6   : > { %p51_p2 = scmp.eq.s32.totalorder %s763_s12, 0  ;;  %p56_p3 = scmp.ne.s32.totalorder %s755_s10, %s751_s9 }
   0x7   : > { %s817_s17 = scalar_select %p41_p0, %s759_s11, %s43_s16  }
   0x8   : > { %p819_p4 = por %p51_p2, %p50_p1  ;;  %p57_p5 = scmp.eq.s32.totalorder %s804_s13, 0 }
   0x9   : > { %p80_p6 = scmp.eq.s32.totalorder %s804_s13, 1  ;;  %p613_p8 = scmp.lt.s32.totalorder %s763_s12, 2 }
   0xa   : > { %p825_p7 = por %p57_p5, %p56_p3  ;;  %s109_s21 = sand.u32 1, %s759_s11  }
   0xb   : > { %p830_p9 = por %p80_p6, %p50_p1  ;;  %s561_s22 = sshll.u32 %s109_s21, 8 }
   0xc   : > { %s605_s23 = sshll.u32 %s763_s12, 8  ;;  %s113_s27 = scalar_lea.vmem [#allocation2], %s561_s22 }
   0xd   : > { %s968_s20 = scalar_select %p830_p9, 1, 0 }
   0xe   : > { %s839_s26 = scalar_lea.hbm %s964_s1, %s605_s23  ;;  %s120_s28 = sshll.u32 %s113_s27, 4  ;;  %s841_s28 = int_to_ptr.vmem [resolvable:$true] %s120_s28 }
   0xf   : > { %p845_p10 = pnand %p613_p8, %p819_p4  ;;  %s849_s30 = scalar_lea.sflag [#allocation3], %s109_s21 }
  0x10   : > { %s699_s3 = scalar_lea.hbm %s839_s26, 4096  ;;  %s704_s6 = scalar_lea.hbm %s964_s1, 8192 }
  0x11   : > { %p700_p11 = scmp.ne.s32.totalorder %s839_s26, %s699_s3  ;;  %p701_p12 = pneg %p845_p10 }
  0x12   : > { %p705_p1 = scmp.lt.u32.totalorder %s839_s26, %s964_s1  ;;  %p706_p2 = scmp.lt.u32.totalorder %s704_s6, %s699_s3 }
  0x13   : > { %p702_p13 = pnand %p701_p12, %p700_p11  ;;  %p708_p4 = scmp.lt.u32.totalorder %s699_s3, %s839_s26 }
  0x14   : > { %p707_p3 = por %p706_p2, %p705_p1 }
  0x15   : > { %p703_p0 = pneg %p702_p13 }
  0x16   : > { %p709_p5 = por %p708_p4, %p707_p3 }
  0x18   : > { %p710_p6 = pnand %p709_p5, %p703_p0 }
  0x1a   : > { %713 = shalt.err (!%p710_p6)
}
  0x1b   : > { %s714_s9 = scalar_lea.vmem %s841_s28, 4096  ;;  %s765_s15 = smov [#allocation2]  }
  0x1c   : > { %p715_p8 = scmp.ne.s32.totalorder %s841_s28, %s714_s9  ;;  %s719_s16 = sshll.u32 %s765_s15, 4  ;;  %s720_s16 = int_to_ptr.vmem [resolvable:$false] %s719_s16 }
  0x1d   : > { %s721_s18 = scalar_lea.vmem %s720_s16, 8192  ;;  %p722_p9 = scmp.lt.s32.totalorder %s841_s28, %s720_s16 }
  0x1e   : > { %p717_p11 = pnand %p715_p8, %p701_p12  ;;  %p723_p1 = scmp.lt.s32.totalorder %s721_s18, %s714_s9 }
  0x20   : > { %p718_p13 = pneg %p717_p11  ;;  %p724_p2 = por %p723_p1, %p722_p9 }
  0x22   : > { %p725_p3 = pnand %p724_p2, %p718_p13 }
  0x24   : > { %728 = shalt.err (!%p725_p3)
}
  0x25   : > { %s766_s21 = smov 512   ;;  %s767_s22 = smov 256  }
  0x26   : > { %s768_s23 = smov 16   ;;  %p564_p12 = scmp.ge.s32.totalorder %s763_s12, 1 }
  0x27   : > { %612 = dma.hbm_to_vmem [thread:$0]  (!%p845_p10), %s839_s26, 4096, %s841_s28, %s849_s30, %s766_s21, %s767_s22, %s768_s23  }
  0x28   : > { %p128_p0 = scmp.lt.s32.totalorder %s763_s12, 3 }
  0x2a   : > { %p129_p4 = pnand %p564_p12, %p128_p0 }
  0x2b   : > { %s880_s24 = sand.u32 (!%p129_p4), 1, %s755_s10  }
  0x2c   : > { %132 = sbr.rel (%p129_p4) target bundleno = 310 (0x136), region = 28  ;;  %s565_s25 = sshll.u32 (!%p129_p4), %s880_s24, 8 }
  0x2d   : > { %s135_s27 = scalar_lea.sflag (!%p129_p4), [#allocation3], %s880_s24  ;;  %s884_s3 = scalar_lea.vmem (!%p129_p4), [#allocation2], %s565_s25 }
  0x33   : > { %746 = dma.done.wait (%p825_p7), %s135_s27, 4096  }
  0x34   : > { %748 = vsyncadd (%p825_p7), %s135_s27, 4294963200  ;;  %v769_v0 = vmov 0   ;;  %v650_v1 = vld [vmem:[%s884_s3 + $0x4] ss:$16 sps:$4 sm:$0xff]   ;;  %v652_v2 = vld [vmem:[%s884_s3 + $0xc] ss:$16 sps:$4 sm:$0xff]  }
  0x35   : > { %393 = vmatprep.mubr.bf16.mxu0 %v769_v0  ;;  %436 = vmatprep.mubr.bf16.mxu1 %v769_v0  ;;  %v654_v3 = vld [vmem:[%s884_s3] ss:$16 sps:$4 sm:$0xff]   ;;  %v655_v4 = vld [vmem:[%s884_s3 + $0x8] ss:$16 sps:$4 sm:$0xff]   ;;  %v656_v5 = vld [vmem:[%s884_s3 + $0x24] ss:$16 sps:$4 sm:$0xff]  }
  0x36   : > { %361 = vmatprep.subr.bf16.mxu0 %v650_v1  ;;  %404 = vmatprep.subr.bf16.mxu1 %v652_v2  ;;  %v658_v6 = vld [vmem:[%s884_s3 + $0x2c] ss:$16 sps:$4 sm:$0xff]   ;;  %v660_v7 = vld [vmem:[%s884_s3 + $0x20] ss:$16 sps:$4 sm:$0xff]   ;;  %v661_v8 = vld [vmem:[%s884_s3 + $0x28] ss:$16 sps:$4 sm:$0xff]  }
  0x37   : > { %362 = vmatpush1.bf16.msra.mxu0 %v654_v3  ;;  %405 = vmatpush1.bf16.msra.mxu1 %v655_v4  ;;  %v662_v9 = vld [vmem:[%s884_s3 + $0x44] ss:$16 sps:$4 sm:$0xff]   ;;  %v664_v10 = vld [vmem:[%s884_s3 + $0x4c] ss:$16 sps:$4 sm:$0xff]   ;;  %v666_v11 = vld [vmem:[%s884_s3 + $0x40] ss:$16 sps:$4 sm:$0xff]  }
  0x38   : > { %363 = vmatprep.subr.bf16.mxu0 %v656_v5  ;;  %406 = vmatprep.subr.bf16.mxu1 %v658_v6  ;;  %v667_v12 = vld [vmem:[%s884_s3 + $0x48] ss:$16 sps:$4 sm:$0xff]   ;;  %v668_v13 = vld [vmem:[%s884_s3 + $0x64] ss:$16 sps:$4 sm:$0xff]   ;;  %v670_v14 = vld [vmem:[%s884_s3 + $0x6c] ss:$16 sps:$4 sm:$0xff]  }
  0x39   : > { %v672_v15 = vld [vmem:[%s884_s3 + $0x60] ss:$16 sps:$4 sm:$0xff]   ;;  %v673_v16 = vld [vmem:[%s884_s3 + $0x68] ss:$16 sps:$4 sm:$0xff]   ;;  %v674_v17 = vld [vmem:[%s884_s3 + $0x84] ss:$16 sps:$4 sm:$0xff]  }
  0x3a   : > { %v676_v18 = vld [vmem:[%s884_s3 + $0x8c] ss:$16 sps:$4 sm:$0xff]   ;;  %v678_v19 = vld [vmem:[%s884_s3 + $0x80] ss:$16 sps:$4 sm:$0xff]   ;;  %v679_v20 = vld [vmem:[%s884_s3 + $0x88] ss:$16 sps:$4 sm:$0xff]  }
  0x3b   : > { %364 = vmatpush1.bf16.msra.mxu0 %v660_v7  ;;  %407 = vmatpush1.bf16.msra.mxu1 %v661_v8  ;;  %v680_v21 = vld [vmem:[%s884_s3 + $0xa4] ss:$16 sps:$4 sm:$0xff]   ;;  %v682_v22 = vld [vmem:[%s884_s3 + $0xac] ss:$16 sps:$4 sm:$0xff]   ;;  %v684_v23 = vld [vmem:[%s884_s3 + $0xa0] ss:$16 sps:$4 sm:$0xff]  }
  0x3c   : > { %365 = vmatprep.subr.bf16.mxu0 %v662_v9  ;;  %408 = vmatprep.subr.bf16.mxu1 %v664_v10  ;;  %v685_v24 = vld [vmem:[%s884_s3 + $0xa8] ss:$16 sps:$4 sm:$0xff]   ;;  %v686_v25 = vld [vmem:[%s884_s3 + $0xc4] ss:$16 sps:$4 sm:$0xff]   ;;  %v688_v26 = vld [vmem:[%s884_s3 + $0xcc] ss:$16 sps:$4 sm:$0xff]  }
  0x3d   : > { %v690_v27 = vld [vmem:[%s884_s3 + $0xc0] ss:$16 sps:$4 sm:$0xff]   ;;  %v691_v28 = vld [vmem:[%s884_s3 + $0xc8] ss:$16 sps:$4 sm:$0xff]   ;;  %v692_v29 = vld [vmem:[%s884_s3 + $0xe4] ss:$16 sps:$4 sm:$0xff]  }
  0x3e   : > { %v694_v30 = vld [vmem:[%s884_s3 + $0xec] ss:$16 sps:$4 sm:$0xff]   ;;  %v696_v31 = vld [vmem:[%s884_s3 + $0xe0] ss:$16 sps:$4 sm:$0xff]   ;;  %v697_v32 = vld [vmem:[%s884_s3 + $0xe8] ss:$16 sps:$4 sm:$0xff]  }
  0x3f   : > { %366 = vmatpush1.bf16.msra.mxu0 %v666_v11  ;;  %409 = vmatpush1.bf16.msra.mxu1 %v667_v12  ;;  %v698_v33 = vld [vmem:[%s963_s0] sm:$0xff]   ;;  %s566_s26 = sshll.u32 %s880_s24, 6  ;;  %p970_p7 = scmp.ne.s32.totalorder %s968_s20, 0 }
  0x40   : > { %367 = vmatprep.subr.bf16.mxu0 %v668_v13  ;;  %410 = vmatprep.subr.bf16.mxu1 %v670_v14  ;;  %s926_s28 = scalar_lea.vmem [#allocation4], %s566_s26  ;;  %s606_s29 = sshll.u32 (%p970_p7), %s804_s13, 5 }
  0x41   : > { %s464_s5 = scalar_lea.vmem (%p970_p7), %s965_s2, %s606_s29 }
  0x43   : > { %368 = vmatpush1.bf16.msra.mxu0 %v672_v15  ;;  %411 = vmatpush1.bf16.msra.mxu1 %v673_v16 }
  0x44   : > { %369 = vmatprep.subr.bf16.mxu0 %v674_v17  ;;  %412 = vmatprep.subr.bf16.mxu1 %v676_v18 }
  0x47   : > { %370 = vmatpush1.bf16.msra.mxu0 %v678_v19  ;;  %413 = vmatpush1.bf16.msra.mxu1 %v679_v20 }
  0x48   : > { %371 = vmatprep.subr.bf16.mxu0 %v680_v21  ;;  %414 = vmatprep.subr.bf16.mxu1 %v682_v22 }
  0x4b   : > { %372 = vmatpush1.bf16.msra.mxu0 %v684_v23  ;;  %415 = vmatpush1.bf16.msra.mxu1 %v685_v24 }
  0x4c   : > { %373 = vmatprep.subr.bf16.mxu0 %v686_v25  ;;  %416 = vmatprep.subr.bf16.mxu1 %v688_v26 }
  0x4f   : > { %374 = vmatpush1.bf16.msra.mxu0 %v690_v27  ;;  %417 = vmatpush1.bf16.msra.mxu1 %v691_v28 }
  0x50   : > { %375 = vmatprep.subr.bf16.mxu0 %v692_v29  ;;  %418 = vmatprep.subr.bf16.mxu1 %v694_v30 }
  0x53   : > { %376 = vmatpush1.bf16.msra.mxu0 %v696_v31  ;;  %419 = vmatpush1.bf16.msra.mxu1 %v697_v32 }
  0x56   : > { %394 = vmatmul.mubr.bf16.vlgmr.msra.gmra.mrb[0].mxu0 %v698_v33  ;;  %437 = vmatmul.mubr.bf16.vlgmr.msra.gmra.mrb[0].mxu1 %v698_v33 }
 0x127   : > { %461 = sbr.rel (!%p970_p7) target bundleno = 310 (0x136), region = 36 }
 0x129   : > { %v395_v34 = vpop.f32.mrb[0].mxu0  ;;  %v438_v35 = vpop.f32.mrb[0].mxu1 }
 0x12a   : > { %447 = vst [vmem:[%s926_s28] sm:$0xff] %v395_v34  ;;  %449 = vst [vmem:[%s926_s28 + $0x10] sm:$0xff] %v438_v35  ;;  %v397_v36 = vpop.f32.mrb[1].mxu0  ;;  %v440_v37 = vpop.f32.mrb[1].mxu1 }
 0x12b   : > { %448 = vst [vmem:[%s926_s28 + $0x8] sm:$0xff] %v397_v36  ;;  %450 = vst [vmem:[%s926_s28 + $0x18] sm:$0xff] %v440_v37  ;;  %v399_v38 = vpop.f32.mrb[2].mxu0  ;;  %v442_v39 = vpop.f32.mrb[2].mxu1 }
 0x12c   : > { %451 = vst [vmem:[%s926_s28 + $0x20] sm:$0xff] %v399_v38  ;;  %453 = vst [vmem:[%s926_s28 + $0x30] sm:$0xff] %v442_v39  ;;  %v401_v40 = vpop.f32.mrb[3].mxu0  ;;  %v444_v41 = vpop.f32.mrb[3].mxu1 }
 0x12d   : > { %452 = vst [vmem:[%s926_s28 + $0x28] sm:$0xff] %v401_v40  ;;  %454 = vst [vmem:[%s926_s28 + $0x38] sm:$0xff] %v444_v41 }
 0x131   : > { %v477_v42 = vld [vmem:[%s926_s28] sm:$0xff]  ;;  %v481_v44 = vld [vmem:[%s926_s28 + $0x10] sm:$0xff] }
 0x132   : > { %v479_v43 = vld [vmem:[%s926_s28 + $0x8] sm:$0xff]  ;;  %v483_v45 = vld [vmem:[%s926_s28 + $0x18] sm:$0xff]  ;;  %478 = vst [vmem:[%s464_s5] sm:$0xff] %v477_v42  ;;  %482 = vst [vmem:[%s464_s5 + $0x10] sm:$0xff] %v481_v44 }
 0x133   : > { %v485_v46 = vld [vmem:[%s926_s28 + $0x20] sm:$0xff]  ;;  %480 = vst [vmem:[%s464_s5 + $0x8] sm:$0xff] %v479_v43  ;;  %484 = vst [vmem:[%s464_s5 + $0x18] sm:$0xff] %v483_v45  ;;  %v489_v48 = vld [vmem:[%s926_s28 + $0x30] sm:$0xff] }
 0x134   : > { %v487_v47 = vld [vmem:[%s926_s28 + $0x28] sm:$0xff]  ;;  %486 = vst [vmem:[%s464_s5 + $0x40] sm:$0xff] %v485_v46  ;;  %v491_v49 = vld [vmem:[%s926_s28 + $0x38] sm:$0xff]  ;;  %490 = vst [vmem:[%s464_s5 + $0x50] sm:$0xff] %v489_v48 }
 0x135   : > { %488 = vst [vmem:[%s464_s5 + $0x48] sm:$0xff] %v487_v47  ;;  %492 = vst [vmem:[%s464_s5 + $0x58] sm:$0xff] %v491_v49 }
 0x136 PF: > { %p12_p9 = scmp.ge.s32.totalorder %s807_s14, 4   ;;  %s971_s9 = smov %s755_s10 }
 0x137   : > { %s972_s10 = smov %s759_s11  ;;  %s973_s11 = smov %s817_s17 }
 0x138   : > { %s974_s12 = smov %s807_s14  ;;  %14 = sbr.rel (!%p12_p9) target bundleno = 3 (0x3), region = 91 }
 0x13f   :  { %508 = vsyncpa [#allocation3], 1 }
 0x140   :  { %510 = vsyncpa [#allocation3 + $0x1], 1 }

</bundles_post_ra>
